<compile_context>
chip_gen: v6e
topology: v6e:2x2x1
jax: 0.10.0
libtpu: 0.0.40
codegen_flags: <defaults>
</compile_context>

<pallas_src>
import functools

import jax
import jax.numpy as jnp
from jax.experimental import pallas as pl
from jax.experimental.pallas import tpu as pltpu

EPS = 1e-5
MATMUL_DTYPE = jnp.bfloat16   # MXU operand + inter-stage activation dtype.


def _pick_tile_m(m, max_tile=2048):
    """Largest power-of-two row tile <= max_tile that divides m."""
    assert m % 8 == 0, "row count must be sublane-aligned (multiple of 8)"
    t = max_tile
    while t >= 8:
        if t <= m and m % t == 0:
            return t
        t //= 2
    return m


def _bn_coeffs(s_ref, ss_ref, g_ref, b_ref, inv_m, eps):
    """Per-channel scale/shift from resident (1,C) sum / sum-of-squares."""
    mean = s_ref[...] * inv_m
    var = ss_ref[...] * inv_m - mean * mean
    scale = g_ref[...] * jax.lax.rsqrt(var + eps)
    shift = b_ref[...] - mean * scale
    return scale, shift


# ------------------------------ Pallas kernels ------------------------------

def _conv1x1_stats_kernel(x_ref, w_ref, y_ref, sum_ref, ssq_ref):
    """Stage 1: y = x @ w (bf16 MXU operands, f32 accum) + per-channel stats."""
    @pl.when(pl.program_id(0) == 0)
    def _init():
        sum_ref[...] = jnp.zeros_like(sum_ref)
        ssq_ref[...] = jnp.zeros_like(ssq_ref)

    y = jnp.dot(x_ref[...], w_ref[...], preferred_element_type=jnp.float32)
    y_ref[...] = y.astype(y_ref.dtype)
    sum_ref[...] += jnp.sum(y, axis=0, keepdims=True)
    ssq_ref[...] += jnp.sum(y * y, axis=0, keepdims=True)


def _bn_relu_conv3x3_stats_kernel(y1_ref, s_ref, ss_ref, g_ref, b_ref, w_ref,
                                  y2_ref, sum_ref, ssq_ref, pad_ref,
                                  *, inv_m, eps, strip):
    """Stage 2 (fused): once per image build relu(BN1(y1)) zero-padded in VMEM;
    per row-strip: im2col (strip*W, 9*C1) -> one K=9*C1 matmul + stats."""
    n = pl.program_id(0)
    s = pl.program_id(1)

    @pl.when(jnp.logical_and(n == 0, s == 0))
    def _init_stats():
        sum_ref[...] = jnp.zeros_like(sum_ref)
        ssq_ref[...] = jnp.zeros_like(ssq_ref)

    Hp, Wp, C1 = pad_ref.shape
    H, W = Hp - 2, Wp - 2

    @pl.when(s == 0)
    def _build_padded_activation():          # once per image n
        scale, shift = _bn_coeffs(s_ref, ss_ref, g_ref, b_ref, inv_m, eps)
        a = jnp.maximum(
            y1_ref[0].astype(jnp.float32) * scale.reshape(1, 1, C1)
            + shift.reshape(1, 1, C1), 0.0)                     # (H, W, C1)
        zrow = jnp.zeros((1, W, C1), jnp.float32)
        zcol = jnp.zeros((H + 2, 1, C1), jnp.float32)
        ap = jnp.concatenate([zrow, a, zrow], axis=0)           # (H+2, W,   C1)
        ap = jnp.concatenate([zcol, ap, zcol], axis=1)          # (H+2, W+2, C1)
        pad_ref[...] = ap

    # im2col for output rows [r0, r0+strip): concatenate the 9 taps on lanes.
    r0 = pl.multiple_of(s * strip, strip)
    taps = []
    for di in range(3):
        for dj in range(3):
            win = pad_ref[pl.ds(r0 + di, strip), dj:dj + W, :]  # (strip, W, C1)
            taps.append(win.reshape(strip * W, C1))
    col = jnp.concatenate(taps, axis=-1).astype(MATMUL_DTYPE)   # (strip*W, 9*C1)

    y = jnp.dot(col, w_ref[...], preferred_element_type=jnp.float32)
    y2_ref[...] = y.astype(y2_ref.dtype)
    sum_ref[...] += jnp.sum(y, axis=0, keepdims=True)
    ssq_ref[...] += jnp.sum(y * y, axis=0, keepdims=True)


def _bn_relu_conv1x1_stats_kernel(y_in_ref, s_ref, ss_ref, g_ref, b_ref, w_ref,
                                  y_ref, sum_ref, ssq_ref, *, inv_m, eps):
    """Stage 3 (fused): a = relu(BN2(y2)); y = a @ w3; + stats of y."""
    @pl.when(pl.program_id(0) == 0)
    def _init():
        sum_ref[...] = jnp.zeros_like(sum_ref)
        ssq_ref[...] = jnp.zeros_like(ssq_ref)

    scale, shift = _bn_coeffs(s_ref, ss_ref, g_ref, b_ref, inv_m, eps)
    a = jnp.maximum(y_in_ref[...].astype(jnp.float32) * scale + shift, 0.0)
    y = jnp.dot(a.astype(MATMUL_DTYPE), w_ref[...],
                preferred_element_type=jnp.float32)
    y_ref[...] = y
    sum_ref[...] += jnp.sum(y, axis=0, keepdims=True)
    ssq_ref[...] += jnp.sum(y * y, axis=0, keepdims=True)


def _bn_add_relu_kernel(y_ref, s_ref, ss_ref, g_ref, b_ref, res_ref, o_ref,
                        *, inv_m, eps):
    """Final elementwise pass: relu(BN3(y3) + identity), lane-dense (C=128)."""
    scale, shift = _bn_coeffs(s_ref, ss_ref, g_ref, b_ref, inv_m, eps)
    o_ref[...] = jnp.maximum(
        y_ref[...] * scale + shift + res_ref[...].astype(jnp.float32), 0.0)


# ------------------------------ pallas wrappers ------------------------------

def conv1x1_with_stats(x, w, *, max_tile=2048):
    M, K = x.shape
    C = w.shape[1]
    tm = _pick_tile_m(M, max_tile)
    return pl.pallas_call(
        _conv1x1_stats_kernel,
        out_shape=(jax.ShapeDtypeStruct((M, C), MATMUL_DTYPE),      # bf16 y1
                   jax.ShapeDtypeStruct((1, C), jnp.float32),
                   jax.ShapeDtypeStruct((1, C), jnp.float32)),
        grid=(M // tm,),
        in_specs=[pl.BlockSpec((tm, K), lambda i: (i, 0)),
                  pl.BlockSpec((K, C), lambda i: (0, 0))],
        out_specs=(pl.BlockSpec((tm, C), lambda i: (i, 0)),
                   pl.BlockSpec((1, C), lambda i: (0, 0)),
                   pl.BlockSpec((1, C), lambda i: (0, 0))),
        compiler_params=pltpu.CompilerParams(
            dimension_semantics=("arbitrary",)),        # stats carry across tiles
    )(x, w)


def bn_relu_conv3x3_with_stats(y1_nhwc, s1, ss1, g1, b1, w2col, m_rows, *, strip=8):
    N, H, W, C1 = y1_nhwc.shape
    C2 = w2col.shape[1]
    assert H % strip == 0 and (strip * W) % 8 == 0
    n_strips = H // strip
    kernel = functools.partial(_bn_relu_conv3x3_stats_kernel,
                               inv_m=1.0 / m_rows, eps=EPS, strip=strip)
    return pl.pallas_call(
        kernel,
        out_shape=(jax.ShapeDtypeStruct((N * H * W, C2), MATMUL_DTYPE),  # bf16 y2
                   jax.ShapeDtypeStruct((1, C2), jnp.float32),
                   jax.ShapeDtypeStruct((1, C2), jnp.float32)),
        grid=(N, n_strips),
        in_specs=[pl.BlockSpec((1, H, W, C1), lambda n, s: (n, 0, 0, 0)),  # resident per n
                  pl.BlockSpec((1, C1), lambda n, s: (0, 0)),
                  pl.BlockSpec((1, C1), lambda n, s: (0, 0)),
                  pl.BlockSpec((1, C1), lambda n, s: (0, 0)),
                  pl.BlockSpec((1, C1), lambda n, s: (0, 0)),
                  pl.BlockSpec((9 * C1, C2), lambda n, s: (0, 0))],
        out_specs=(pl.BlockSpec((strip * W, C2),
                                lambda n, s: (n * n_strips + s, 0)),
                   pl.BlockSpec((1, C2), lambda n, s: (0, 0)),
                   pl.BlockSpec((1, C2), lambda n, s: (0, 0))),
        scratch_shapes=[pltpu.VMEM((H + 2, W + 2, C1), jnp.float32)],
        compiler_params=pltpu.CompilerParams(
            dimension_semantics=("arbitrary", "arbitrary")),
    )(y1_nhwc, s1, ss1, g1, b1, w2col)


def bn_relu_conv1x1_with_stats(y_in, s_in, ss_in, g, b, w, m_rows, *, max_tile=2048):
    M, K = y_in.shape
    C = w.shape[1]
    tm = _pick_tile_m(M, max_tile)
    kernel = functools.partial(_bn_relu_conv1x1_stats_kernel,
                               inv_m=1.0 / m_rows, eps=EPS)
    return pl.pallas_call(
        kernel,
        out_shape=(jax.ShapeDtypeStruct((M, C), jnp.float32),        # f32 y3 (C=128, lane-dense)
                   jax.ShapeDtypeStruct((1, C), jnp.float32),
                   jax.ShapeDtypeStruct((1, C), jnp.float32)),
        grid=(M // tm,),
        in_specs=[pl.BlockSpec((tm, K), lambda i: (i, 0)),
                  pl.BlockSpec((1, K), lambda i: (0, 0)),
                  pl.BlockSpec((1, K), lambda i: (0, 0)),
                  pl.BlockSpec((1, K), lambda i: (0, 0)),
                  pl.BlockSpec((1, K), lambda i: (0, 0)),
                  pl.BlockSpec((K, C), lambda i: (0, 0))],
        out_specs=(pl.BlockSpec((tm, C), lambda i: (i, 0)),
                   pl.BlockSpec((1, C), lambda i: (0, 0)),
                   pl.BlockSpec((1, C), lambda i: (0, 0))),
        compiler_params=pltpu.CompilerParams(
            dimension_semantics=("arbitrary",)),
    )(y_in, s_in, ss_in, g, b, w)


def bn_add_relu(y, s, ss, g, b, residual, m_rows, *, max_tile=2048):
    M, C = y.shape
    tm = _pick_tile_m(M, max_tile)
    kernel = functools.partial(_bn_add_relu_kernel, inv_m=1.0 / m_rows, eps=EPS)
    return pl.pallas_call(
        kernel,
        out_shape=jax.ShapeDtypeStruct((M, C), jnp.float32),
        grid=(M // tm,),
        in_specs=[pl.BlockSpec((tm, C), lambda i: (i, 0)),
                  pl.BlockSpec((1, C), lambda i: (0, 0)),
                  pl.BlockSpec((1, C), lambda i: (0, 0)),
                  pl.BlockSpec((1, C), lambda i: (0, 0)),
                  pl.BlockSpec((1, C), lambda i: (0, 0)),
                  pl.BlockSpec((tm, C), lambda i: (i, 0))],
        out_specs=pl.BlockSpec((tm, C), lambda i: (i, 0)),
        compiler_params=pltpu.CompilerParams(
            dimension_semantics=("parallel",)),
    )(y, s, ss, g, b, residual)


# --------------------------------- forward -----------------------------------

def bottleneck_forward(x_nchw, params, stride=1):
    """Bottleneck with downsample=None (requires stride==1, Cin == planes*4)."""
    assert stride == 1, "downsample=None path requires stride == 1"
    N, Cin, H, W = x_nchw.shape
    C3 = params["w3"].shape[1]
    assert Cin == C3, "identity residual requires inplanes == planes * expansion"

    # NCHW -> NHWC with the f32->bf16 cast folded into the same relayout pass.
    x2d = jnp.transpose(x_nchw, (0, 2, 3, 1)).astype(MATMUL_DTYPE) \
             .reshape(N * H * W, Cin)
    M = N * H * W

    # conv1 (1x1) + BN1 stats
    y1, s1, ss1 = conv1x1_with_stats(x2d, params["w1"])

    # fused BN1+ReLU -> conv2 (3x3, pad 1, im2col K=9*C1) + BN2 stats
    C1 = params["w1"].shape[1]
    y2, s2, ss2 = bn_relu_conv3x3_with_stats(
        y1.reshape(N, H, W, C1), s1, ss1, params["g1"], params["b1"],
        params["w2col"], m_rows=M)

    # fused BN2+ReLU -> conv3 (1x1) + BN3 stats
    y3, s3, ss3 = bn_relu_conv1x1_with_stats(
        y2, s2, ss2, params["g2"], params["b2"], params["w3"], m_rows=M)

    # BN3 + identity add + ReLU (C = planes*4 = 128: lane-dense stores)
    out = bn_add_relu(y3, s3, ss3, params["g3"], params["b3"], x2d, m_rows=M)

    out = out.reshape(N, H, W, C3)
    # TODO(synk): skip this transpose when the downstream consumer accepts NHWC.
    return jnp.transpose(out, (0, 3, 1, 2))


# ----------------------------- pure-JAX reference ----------------------------

def _ref_bn_train(x_nchw, g, b):
    mean = x_nchw.mean(axis=(0, 2, 3), keepdims=True)
    var = jnp.square(x_nchw - mean).mean(axis=(0, 2, 3), keepdims=True)
    return (x_nchw - mean) * jax.lax.rsqrt(var + EPS) \
        * g.reshape(1, -1, 1, 1) + b.reshape(1, -1, 1, 1)


def bottleneck_reference(x, torch_params, stride=1):
    conv = lambda x, w, s, p: jax.lax.conv_general_dilated(
        x, w, window_strides=(s, s), padding=[(p, p), (p, p)],
        dimension_numbers=("NCHW", "OIHW", "NCHW"))
    identity = x
    out = jax.nn.relu(_ref_bn_train(conv(x, torch_params["w1"], 1, 0),
                                    torch_params["g1"], torch_params["b1"]))
    out = jax.nn.relu(_ref_bn_train(conv(out, torch_params["w2"], stride, 1),
                                    torch_params["g2"], torch_params["b2"]))
    out = _ref_bn_train(conv(out, torch_params["w3"], 1, 0),
                        torch_params["g3"], torch_params["b3"])
    return jax.nn.relu(out + identity)


# ------------------------------------ main ------------------------------------

if __name__ == "__main__":
    inplanes, planes, stride = 128, 32, 1       # expansion=4 -> out channels 128
    N, H, W = 2, 16, 16                         # M = N*H*W = 512

    key = jax.random.PRNGKey(0)
    kx, k1, k2, k3, kg = jax.random.split(key, 5)

    x = jax.random.normal(kx, (N, inplanes, H, W), dtype=jnp.float32)

    # PyTorch-layout weights (OIHW), deterministic init.
    w1_t = 0.1 * jax.random.normal(k1, (planes, inplanes, 1, 1), jnp.float32)
    w2_t = 0.1 * jax.random.normal(k2, (planes, planes, 3, 3), jnp.float32)
    w3_t = 0.1 * jax.random.normal(k3, (planes * 4, planes, 1, 1), jnp.float32)

    kg1, kg2, kg3, kb1, kb2, kb3 = jax.random.split(kg, 6)
    g1 = 1.0 + 0.1 * jax.random.normal(kg1, (planes,), jnp.float32)
    g2 = 1.0 + 0.1 * jax.random.normal(kg2, (planes,), jnp.float32)
    g3 = 1.0 + 0.1 * jax.random.normal(kg3, (planes * 4,), jnp.float32)
    b1 = 0.1 * jax.random.normal(kb1, (planes,), jnp.float32)
    b2 = 0.1 * jax.random.normal(kb2, (planes,), jnp.float32)
    b3 = 0.1 * jax.random.normal(kb3, (planes * 4,), jnp.float32)

    # Kernel-layout weights (bf16 MXU operands):
    #   1x1 conv: (Cin, Cout);  3x3 conv: im2col layout (9*Cin, Cout),
    #   row index = (kh*3 + kw)*Cin + cin  (matches in-kernel tap concat order).
    params = dict(
        w1=jnp.transpose(w1_t[:, :, 0, 0], (1, 0)).astype(MATMUL_DTYPE),
        w2col=jnp.transpose(w2_t, (2, 3, 1, 0)).reshape(9 * planes, planes)
                 .astype(MATMUL_DTYPE),
        w3=jnp.transpose(w3_t[:, :, 0, 0], (1, 0)).astype(MATMUL_DTYPE),
        g1=g1.reshape(1, -1), b1=b1.reshape(1, -1),
        g2=g2.reshape(1, -1), b2=b2.reshape(1, -1),
        g3=g3.reshape(1, -1), b3=b3.reshape(1, -1),
    )
    torch_params = dict(w1=w1_t, w2=w2_t, w3=w3_t,
                        g1=g1, b1=b1, g2=g2, b2=b2, g3=g3, b3=b3)

    out = jax.block_until_ready(bottleneck_forward(x, params, stride=stride))
    ref = jax.block_until_ready(bottleneck_reference(x, torch_params, stride=stride))

    assert out.shape == (N, planes * 4, H, W), out.shape
    err = jnp.abs(out - ref)
    max_err = float(jnp.max(err))
    mean_err = float(jnp.mean(err))
    # bf16 MXU operands / bf16 inter-stage activations vs f32 reference conv.
    assert max_err < 8e-2, f"max abs error {max_err}"
    assert mean_err < 2e-2, f"mean abs error {mean_err}"

    print("KERNEL_OK")
</pallas_src>

<mosaic_0001>
module attributes {stable_mosaic.version = 11 : i64} {
  func.func @_conv1x1_stats_kernel(%arg0: i32, %arg1: memref<512x128xbf16, #tpu.memory_space<vmem>>, %arg2: memref<128x32xbf16, #tpu.memory_space<vmem>>, %arg3: memref<512x32xbf16, #tpu.memory_space<vmem>>, %arg4: memref<1x32xf32, #tpu.memory_space<vmem>>, %arg5: memref<1x32xf32, #tpu.memory_space<vmem>>) attributes {dimension_semantics = [#tpu.dimension_semantics<arbitrary>], iteration_bounds = array<i64: 1>, scalar_prefetch = 0 : i64, scratch_operands = 0 : i64, tpu.core_type = #tpu.core_type<tc>, window_params = [{transform_indices = @transform_0, window_bounds = array<i64: 512, 128>}, {pipeline_mode = #tpu.pipeline_mode<synchronous>, transform_indices = @transform_1, window_bounds = array<i64: 128, 32>}, {transform_indices = @transform_2, window_bounds = array<i64: 512, 32>}, {pipeline_mode = #tpu.pipeline_mode<synchronous>, transform_indices = @transform_3, window_bounds = array<i64: 1, 32>}, {pipeline_mode = #tpu.pipeline_mode<synchronous>, transform_indices = @transform_4, window_bounds = array<i64: 1, 32>}]} {
    %c0_i32 = arith.constant 0 : i32
    %0 = arith.cmpi eq, %arg0, %c0_i32 : i32
    %1 = arith.extui %0 : i1 to i32
    %c0_i32_0 = arith.constant 0 : i32
    %2 = arith.cmpi ne, %1, %c0_i32_0 : i32
    scf.if %2 {
      %cst_16 = arith.constant 0.000000e+00 : f32
      %19 = vector.broadcast %cst_16 : f32 to vector<1x32xf32>
      %c0_17 = arith.constant 0 : index
      %c0_18 = arith.constant 0 : index
      %20 = vector.load %arg4[%c0_17, %c0_18] : memref<1x32xf32, #tpu.memory_space<vmem>>, vector<1x32xf32>
      tpu.vector_store %arg4[%c0_17, %c0_18], %19 {strides = array<i32>} : memref<1x32xf32, #tpu.memory_space<vmem>>, vector<1x32xf32>,
      %cst_19 = arith.constant 0.000000e+00 : f32
      %21 = vector.broadcast %cst_19 : f32 to vector<1x32xf32>
      %c0_20 = arith.constant 0 : index
      %c0_21 = arith.constant 0 : index
      %22 = vector.load %arg5[%c0_20, %c0_21] : memref<1x32xf32, #tpu.memory_space<vmem>>, vector<1x32xf32>
      tpu.vector_store %arg5[%c0_20, %c0_21], %21 {strides = array<i32>} : memref<1x32xf32, #tpu.memory_space<vmem>>, vector<1x32xf32>,
    } else {
    }
    %c0 = arith.constant 0 : index
    %c0_1 = arith.constant 0 : index
    %3 = vector.load %arg1[%c0, %c0_1] : memref<512x128xbf16, #tpu.memory_space<vmem>>, vector<512x128xbf16>
    %c0_2 = arith.constant 0 : index
    %c0_3 = arith.constant 0 : index
    %4 = vector.load %arg2[%c0_2, %c0_3] : memref<128x32xbf16, #tpu.memory_space<vmem>>, vector<128x32xbf16>
    %cst = arith.constant dense<0.000000e+00> : vector<512x32xf32>
    %5 = tpu.matmul %3, %4, %cst {dimension_numbers = #tpu.dot_dimension_numbers<[1], [0], [0], [1], [0, 0, 1, 1], [], []>} : vector<512x128xbf16>, vector<128x32xbf16>, vector<512x32xf32> -> vector<512x32xf32>
    %6 = arith.truncf %5 : vector<512x32xf32> to vector<512x32xbf16>
    %c0_4 = arith.constant 0 : index
    %c0_5 = arith.constant 0 : index
    %7 = vector.load %arg3[%c0_4, %c0_5] : memref<512x32xbf16, #tpu.memory_space<vmem>>, vector<512x32xbf16>
    tpu.vector_store %arg3[%c0_4, %c0_5], %6 {strides = array<i32>} : memref<512x32xbf16, #tpu.memory_space<vmem>>, vector<512x32xbf16>,
    %c0_6 = arith.constant 0 : index
    %c0_7 = arith.constant 0 : index
    %8 = vector.load %arg4[%c0_6, %c0_7] : memref<1x32xf32, #tpu.memory_space<vmem>>, vector<1x32xf32>
    %cst_8 = arith.constant dense<0.000000e+00> : vector<32xf32>
    %9 = vector.multi_reduction <add>, %5, %cst_8 [0] : vector<512x32xf32> to vector<32xf32>
    %10 = vector.shape_cast %9 : vector<32xf32> to vector<1x32xf32>
    %11 = arith.addf %8, %10 : vector<1x32xf32>
    %c0_9 = arith.constant 0 : index
    %c0_10 = arith.constant 0 : index
    %12 = vector.load %arg4[%c0_9, %c0_10] : memref<1x32xf32, #tpu.memory_space<vmem>>, vector<1x32xf32>
    tpu.vector_store %arg4[%c0_9, %c0_10], %11 {strides = array<i32>} : memref<1x32xf32, #tpu.memory_space<vmem>>, vector<1x32xf32>,
    %c0_11 = arith.constant 0 : index
    %c0_12 = arith.constant 0 : index
    %13 = vector.load %arg5[%c0_11, %c0_12] : memref<1x32xf32, #tpu.memory_space<vmem>>, vector<1x32xf32>
    %14 = arith.mulf %5, %5 : vector<512x32xf32>
    %cst_13 = arith.constant dense<0.000000e+00> : vector<32xf32>
    %15 = vector.multi_reduction <add>, %14, %cst_13 [0] : vector<512x32xf32> to vector<32xf32>
    %16 = vector.shape_cast %15 : vector<32xf32> to vector<1x32xf32>
    %17 = arith.addf %13, %16 : vector<1x32xf32>
    %c0_14 = arith.constant 0 : index
    %c0_15 = arith.constant 0 : index
    %18 = vector.load %arg5[%c0_14, %c0_15] : memref<1x32xf32, #tpu.memory_space<vmem>>, vector<1x32xf32>
    tpu.vector_store %arg5[%c0_14, %c0_15], %17 {strides = array<i32>} : memref<1x32xf32, #tpu.memory_space<vmem>>, vector<1x32xf32>,
    return
  }
  func.func @transform_0(%arg0: i32) -> (i32, i32) {
    %c0_i32 = arith.constant 0 : i32
    %c0_i32_0 = arith.constant 0 : i32
    return %arg0, %c0_i32 : i32, i32
  }
  func.func @transform_1(%arg0: i32) -> (i32, i32) {
    %c0_i32 = arith.constant 0 : i32
    %c0_i32_0 = arith.constant 0 : i32
    %c0_i32_1 = arith.constant 0 : i32
    return %c0_i32, %c0_i32_0 : i32, i32
  }
  func.func @transform_2(%arg0: i32) -> (i32, i32) {
    %c0_i32 = arith.constant 0 : i32
    %c0_i32_0 = arith.constant 0 : i32
    return %arg0, %c0_i32 : i32, i32
  }
  func.func @transform_3(%arg0: i32) -> (i32, i32) {
    %c0_i32 = arith.constant 0 : i32
    %c0_i32_0 = arith.constant 0 : i32
    %c0_i32_1 = arith.constant 0 : i32
    return %c0_i32, %c0_i32_0 : i32, i32
  }
  func.func @transform_4(%arg0: i32) -> (i32, i32) {
    %c0_i32 = arith.constant 0 : i32
    %c0_i32_0 = arith.constant 0 : i32
    %c0_i32_1 = arith.constant 0 : i32
    return %c0_i32, %c0_i32_0 : i32, i32
  }
}

</mosaic_0001>

<bundles_post_ra>
// kernel: tpu_custom_call.1
= control target key start
LH: loop header
LB: loop body
LE: loop exit
PB: predicated region body
PF: predicated region fallthrough
CT: control target
= control target key end

     0   :  { %10 = vsyncpa [#allocation3], 0  ;;  %s2431_s0 = inlined_call_operand.hbm [shape: bf16[512,128], index: 0, kind: input, shape index: {}]   ;;  %s2432_s1 = inlined_call_operand.vmem [shape: bf16[128,32], index: 1, kind: input, shape index: {}]   ;;  %s2433_s2 = inlined_call_operand.vmem [shape: bf16[512,32], index: 2, kind: output, shape index: {0}]   ;;  %s2434_s3 = inlined_call_operand.hbm [shape: f32[1,32], index: 3, kind: output, shape index: {1}]   ;;  %s2435_s4 = inlined_call_operand.hbm [shape: f32[1,32], index: 4, kind: output, shape index: {2}]  }
   0x1   :  { %11 = vsyncpa [#allocation4], 0 }
   0x2   :  { %12 = vsyncpa [#allocation7], 0  ;;  %s1755_s15 = smov [#allocation2]  }
   0x3   :  { %s18_s16 = sshll.u32 %s1755_s15, 4  ;;  %s19_s16 = int_to_ptr.vmem [resolvable:$true] %s18_s16 }
   0x4   :  { %s1697_s17 = scalar_lea.vmem %s19_s16, 4096  ;;  %p1702_p1 = scmp.lt.s32.totalorder %s19_s16, %s19_s16 }
   0x5   :  { %p1698_p0 = scmp.ne.s32.totalorder %s19_s16, %s1697_s17  ;;  %p1703_p2 = scmp.lt.s32.totalorder %s1697_s17, %s1697_s17 }
   0x7   :  { %p1704_p3 = por %p1703_p2, %p1702_p1 }
   0x9   :  { %p1705_p4 = pnand %p1704_p3, %p1698_p0 }
   0xb   :  { %1708 = shalt.err (!%p1705_p4)
}
   0xc   :  { %s1756_s18 = smov 64   ;;  %s1757_s19 = smov 4  }
   0xd   :  { %24 = dma.hbm_to_vmem [thread:$0]  %s2431_s0, 4096, %s19_s16, [#allocation3], %s1756_s18, %s1756_s18, %s1757_s19  }
   0xe   :  { %1749 = dma.done.wait [#allocation3], 4096  }
   0xf   :  { %1750 = vsyncadd [#allocation3], 4294963200  ;;  %v1649_v0 = vld [vmem:[%s2432_s1 + $0x38] sm:$0xff]   ;;  %v1650_v1 = vld [vmem:[%s2432_s1 + $0x30] sm:$0xff]   ;;  %vm903_vm0 = vcmask 257024   ;;  %vm969_vm1 = vcmask 261120  }
  0x10   :  { %1547 = vmatprep.subr.bf16.mxu0 %v1649_v0  ;;  %1627 = vmatprep.subr.bf16.mxu1 %v1649_v0  ;;  %v1651_v2 = vld [vmem:[%s2432_s1 + $0x28] sm:$0xff]   ;;  %v1652_v3 = vld [vmem:[%s2432_s1 + $0x20] sm:$0xff]   ;;  %v1653_v5 = vld [vmem:[%s2432_s1 + $0x18] sm:$0xff]   ;;  %vm35_vm2 = vcmask 253952   ;;  %s1760_s27 = smov [#allocation6]  }
  0x11   :  { %1548 = vmatpush3.bf16.msra.mxu0 %v1649_v0  ;;  %1635 = vmatpush3.bf16.msra.mxu1 %v1649_v0  ;;  %v1657_v4 = vld [vmem:[#allocation2] sm:$0xff]   ;;  %v1654_v6 = vld [vmem:[%s2432_s1 + $0x10] sm:$0xff]   ;;  %v1655_v7 = vld [vmem:[%s2432_s1 + $0x8] sm:$0xff]   ;;  %s1324_s0 = sshll.u32 %s1760_s27, 4  ;;  %s1325_s0 = int_to_ptr.vmem [resolvable:$true] %s1324_s0 }
  0x12   :  { %1549 = vmatprep.subr.bf16.mxu0 %v1650_v1  ;;  %1628 = vmatprep.subr.bf16.mxu1 %v1650_v1  ;;  %v1656_v8 = vld [vmem:[%s2432_s1] sm:$0xff]   ;;  %v1658_v10 = vld [vmem:[#allocation2 + $0x8] sm:$0xff]   ;;  %v1659_v11 = vld [vmem:[#allocation2 + $0x10] sm:$0xff]  }
  0x13   :  { %1563 = vmatprep.mubr.bf16.mxu0 %v1657_v4  ;;  %v1673_v9 = vld [vmem:[#allocation2 + $0x80] sm:$0xff]   ;;  %v1674_v12 = vld [vmem:[#allocation2 + $0x88] sm:$0xff]   ;;  %v1675_v13 = vld [vmem:[#allocation2 + $0x90] sm:$0xff]  }
  0x14   :  { %1595 = vmatprep.mubr.bf16.mxu1 %v1673_v9  ;;  %v1660_v14 = vld [vmem:[#allocation2 + $0x18] sm:$0xff]   ;;  %v1661_v15 = vld [vmem:[#allocation2 + $0x20] sm:$0xff]   ;;  %v1662_v18 = vld [vmem:[#allocation2 + $0x28] sm:$0xff]  }
  0x15   :  { %1550 = vmatpush3.bf16.msra.mxu0 %v1650_v1  ;;  %1636 = vmatpush3.bf16.msra.mxu1 %v1650_v1  ;;  %v1676_v16 = vld [vmem:[#allocation2 + $0x98] sm:$0xff]   ;;  %v1677_v17 = vld [vmem:[#allocation2 + $0xa0] sm:$0xff]   ;;  %v1678_v19 = vld [vmem:[#allocation2 + $0xa8] sm:$0xff]  }
  0x16   :  { %1551 = vmatprep.subr.bf16.mxu0 %v1651_v2  ;;  %1629 = vmatprep.subr.bf16.mxu1 %v1651_v2  ;;  %v1663_v20 = vld [vmem:[#allocation2 + $0x30] sm:$0xff]   ;;  %v1664_v22 = vld [vmem:[#allocation2 + $0x38] sm:$0xff]   ;;  %v1665_v24 = vld [vmem:[#allocation2 + $0x40] sm:$0xff]  }
  0x17   :  { %v1679_v21 = vld [vmem:[#allocation2 + $0xb0] sm:$0xff]   ;;  %v1680_v23 = vld [vmem:[#allocation2 + $0xb8] sm:$0xff]   ;;  %v1681_v25 = vld [vmem:[#allocation2 + $0xc0] sm:$0xff]  }
  0x18   :  { %v1666_v26 = vld [vmem:[#allocation2 + $0x48] sm:$0xff]   ;;  %v1667_v28 = vld [vmem:[#allocation2 + $0x50] sm:$0xff]   ;;  %v1668_v30 = vld [vmem:[#allocation2 + $0x58] sm:$0xff]  }
  0x19   :  { %1552 = vmatpush3.bf16.msra.mxu0 %v1651_v2  ;;  %1637 = vmatpush3.bf16.msra.mxu1 %v1651_v2  ;;  %v1682_v27 = vld [vmem:[#allocation2 + $0xc8] sm:$0xff]   ;;  %v1683_v29 = vld [vmem:[#allocation2 + $0xd0] sm:$0xff]   ;;  %v1684_v31 = vld [vmem:[#allocation2 + $0xd8] sm:$0xff]  }
  0x1a   :  { %1553 = vmatprep.subr.bf16.mxu0 %v1652_v3  ;;  %1630 = vmatprep.subr.bf16.mxu1 %v1652_v3  ;;  %v1669_v32 = vld [vmem:[#allocation2 + $0x60] sm:$0xff]   ;;  %v1670_v34 = vld [vmem:[#allocation2 + $0x68] sm:$0xff]   ;;  %v1671_v36 = vld [vmem:[#allocation2 + $0x70] sm:$0xff]  }
  0x1b   :  { %v1685_v33 = vld [vmem:[#allocation2 + $0xe0] sm:$0xff]   ;;  %v1686_v35 = vld [vmem:[#allocation2 + $0xe8] sm:$0xff]   ;;  %v1687_v37 = vld [vmem:[#allocation2 + $0xf0] sm:$0xff]  }
  0x1c   :  { %v1672_v38 = vld [vmem:[#allocation2 + $0x78] sm:$0xff]  }
  0x1d   :  { %1554 = vmatpush3.bf16.msra.mxu0 %v1652_v3  ;;  %1638 = vmatpush3.bf16.msra.mxu1 %v1652_v3  ;;  %v1688_v39 = vld [vmem:[#allocation2 + $0xf8] sm:$0xff]  }
  0x1e   :  { %1555 = vmatprep.subr.bf16.mxu0 %v1653_v5  ;;  %1631 = vmatprep.subr.bf16.mxu1 %v1653_v5 }
  0x21   :  { %1556 = vmatpush3.bf16.msra.mxu0 %v1653_v5  ;;  %1639 = vmatpush3.bf16.msra.mxu1 %v1653_v5 }
  0x22   :  { %1557 = vmatprep.subr.bf16.mxu0 %v1654_v6  ;;  %1632 = vmatprep.subr.bf16.mxu1 %v1654_v6 }
  0x25   :  { %1558 = vmatpush3.bf16.msra.mxu0 %v1654_v6  ;;  %1640 = vmatpush3.bf16.msra.mxu1 %v1654_v6 }
  0x26   :  { %1559 = vmatprep.subr.bf16.mxu0 %v1655_v7  ;;  %1633 = vmatprep.subr.bf16.mxu1 %v1655_v7 }
  0x29   :  { %1560 = vmatpush3.bf16.msra.mxu0 %v1655_v7  ;;  %1641 = vmatpush3.bf16.msra.mxu1 %v1655_v7 }
  0x2a   :  { %1561 = vmatprep.subr.bf16.mxu0 %v1656_v8  ;;  %1634 = vmatprep.subr.bf16.mxu1 %v1656_v8 }
  0x2d   :  { %1562 = vmatpush3.bf16.msra.mxu0 %v1656_v8  ;;  %1642 = vmatpush3.bf16.msra.mxu1 %v1656_v8 }
  0x30   :  { %1564 = vmatmul.mubr.bf16.vlgmr.msra.gmra.mxu0 %v1658_v10  ;;  %1596 = vmatmul.mubr.bf16.vlgmr.msra.gmra.mxu1 %v1674_v12 }
  0x31   :  { %1567 = vmatprep.mubr.bf16.mxu0 %v1659_v11  ;;  %1599 = vmatprep.mubr.bf16.mxu1 %v1675_v13 }
  0x38   :  { %1568 = vmatmul.mubr.bf16.gmra.mxu0 %v1660_v14  ;;  %1600 = vmatmul.mubr.bf16.gmra.mxu1 %v1676_v16 }
  0x39   :  { %1571 = vmatprep.mubr.bf16.mxu0 %v1661_v15  ;;  %1603 = vmatprep.mubr.bf16.mxu1 %v1677_v17 }
  0x40   :  { %1572 = vmatmul.mubr.bf16.gmra.mxu0 %v1662_v18  ;;  %1604 = vmatmul.mubr.bf16.gmra.mxu1 %v1678_v19 }
  0x41   :  { %1575 = vmatprep.mubr.bf16.mxu0 %v1663_v20  ;;  %1607 = vmatprep.mubr.bf16.mxu1 %v1679_v21 }
  0x48   :  { %1576 = vmatmul.mubr.bf16.gmra.mxu0 %v1664_v22  ;;  %1608 = vmatmul.mubr.bf16.gmra.mxu1 %v1680_v23 }
  0x49   :  { %1579 = vmatprep.mubr.bf16.mxu0 %v1665_v24  ;;  %1611 = vmatprep.mubr.bf16.mxu1 %v1681_v25 }
  0x50   :  { %1580 = vmatmul.mubr.bf16.gmra.mxu0 %v1666_v26  ;;  %1612 = vmatmul.mubr.bf16.gmra.mxu1 %v1682_v27 }
  0x51   :  { %1583 = vmatprep.mubr.bf16.mxu0 %v1667_v28  ;;  %1615 = vmatprep.mubr.bf16.mxu1 %v1683_v29 }
  0x58   :  { %1584 = vmatmul.mubr.bf16.gmra.mxu0 %v1668_v30  ;;  %1616 = vmatmul.mubr.bf16.gmra.mxu1 %v1684_v31 }
  0x59   :  { %1587 = vmatprep.mubr.bf16.mxu0 %v1669_v32  ;;  %1619 = vmatprep.mubr.bf16.mxu1 %v1685_v33 }
  0x60   :  { %1588 = vmatmul.mubr.bf16.gmra.mxu0 %v1670_v34  ;;  %1620 = vmatmul.mubr.bf16.gmra.mxu1 %v1686_v35 }
  0x61   :  { %1591 = vmatprep.mubr.bf16.mxu0 %v1671_v36  ;;  %1623 = vmatprep.mubr.bf16.mxu1 %v1687_v37 }
  0x68   :  { %1592 = vmatmul.mubr.bf16.gmra.mxu0 %v1672_v38  ;;  %1624 = vmatmul.mubr.bf16.gmra.mxu1 %v1688_v39 }
  0xf0   :  { %v1565_v40 = vpop.f32.mrf.mxu0  ;;  %v1813_v41 = vpop.f32.mrf.mxu1 }
  0xf1   :  { %v1445_v42 = vpack.c.bf16 %v1565_v40, %v1565_v40  ;;  %v1477_v43 = vpack.c.bf16 %v1813_v41, %v1813_v41  ;;  %v1109_v52 = vmul.f32 %v1565_v40, %v1565_v40  ;;  %v973_v60 = vsel %vm969_vm1, %v1565_v40, 0.0 }
  0xf2   :  { %v392_v44 = vpop.f32.mrf.mxu0  ;;  %v1817_v45 = vpop.f32.mrf.mxu1 }
  0xf3   :  { %906 = vst.msk [vmem:[%s2433_s2 + $0x8] sm:$0xf] %vm903_vm0, %v1445_v42  ;;  %v1443_v46 = vpack.c.bf16 %v392_v44, %v392_v44  ;;  %938 = vst.msk [vmem:[%s2433_s2 + $0x88] sm:$0xf] %vm903_vm0, %v1477_v43  ;;  %v1475_v48 = vpack.c.bf16 %v1817_v45, %v1817_v45  ;;  %v1107_v50 = vmul.f32 %v392_v44, %v392_v44  ;;  %v970_v56 = vsel %vm969_vm1, %v392_v44, 0.0 }
  0xf4   :  { %v1566_v47 = vpop.f32.mrf.mxu0  ;;  %v1829_v49 = vpop.f32.mrf.mxu1  ;;  %v1174_v10 = vsel %vm969_vm1, %v1109_v52, 0.0 }
  0xf5   :  { %904 = vst.msk [vmem:[%s2433_s2] sm:$0xf] %vm903_vm0, %v1443_v46  ;;  %v1446_v51 = vpack.c.bf16 %v1566_v47, %v1566_v47  ;;  %936 = vst.msk [vmem:[%s2433_s2 + $0x80] sm:$0xf] %vm903_vm0, %v1475_v48  ;;  %v1478_v54 = vpack.c.bf16 %v1829_v49, %v1829_v49  ;;  %v1171_v1 = vsel %vm969_vm1, %v1107_v50, 0.0  ;;  %v1110_v2 = vmul.f32 %v1566_v47, %v1566_v47 }
  0xf6   :  { %v395_v53 = vpop.f32.mrf.mxu0  ;;  %v1841_v55 = vpop.f32.mrf.mxu1  ;;  %v975_v11 = vsel %vm969_vm1, %v1566_v47, 0.0 }
  0xf7   :  { %907 = vst.msk [vmem:[%s2433_s2 + $0xc] sm:$0xf] %vm903_vm0, %v1446_v51  ;;  %v1444_v57 = vpack.c.bf16 %v395_v53, %v395_v53  ;;  %v971_v58 = vsel %vm969_vm1, %v395_v53, 0.0  ;;  %v1108_v59 = vmul.f32 %v395_v53, %v395_v53  ;;  %939 = vst.msk [vmem:[%s2433_s2 + $0x8c] sm:$0xf] %vm903_vm0, %v1478_v54  ;;  %v1476_v63 = vpack.c.bf16 %v1841_v55, %v1841_v55 }
  0xf8   :  { %v972_v61 = vadd.f32 %v971_v58, %v970_v56  ;;  %v1569_v62 = vpop.f32.mrf.mxu0  ;;  %v1856_v0 = vpop.f32.mrf.mxu1  ;;  %v1176_v18 = vsel %vm969_vm1, %v1110_v2, 0.0 }
  0xf9   :  { %905 = vst.msk [vmem:[%s2433_s2 + $0x4] sm:$0xf] %vm903_vm0, %v1444_v57  ;;  %v1172_v3 = vsel %vm969_vm1, %v1108_v59, 0.0  ;;  %v1449_v4 = vpack.c.bf16 %v1569_v62, %v1569_v62  ;;  %937 = vst.msk [vmem:[%s2433_s2 + $0x84] sm:$0xf] %vm903_vm0, %v1476_v63  ;;  %v1481_v8 = vpack.c.bf16 %v1856_v0, %v1856_v0  ;;  %v1113_v21 = vmul.f32 %v1569_v62, %v1569_v62 }
  0xfa   :  { %v974_v5 = vadd.f32 %v973_v60, %v972_v61  ;;  %v1173_v6 = vadd.f32 %v1172_v3, %v1171_v1  ;;  %v408_v7 = vpop.f32.mrf.mxu0  ;;  %v1870_v9 = vpop.f32.mrf.mxu1  ;;  %v981_v35 = vsel %vm969_vm1, %v1569_v62, 0.0 }
  0xfb   :  { %910 = vst.msk [vmem:[%s2433_s2 + $0x18] sm:$0xf] %vm903_vm0, %v1449_v4  ;;  %v1447_v12 = vpack.c.bf16 %v408_v7, %v408_v7  ;;  %v1111_v13 = vmul.f32 %v408_v7, %v408_v7  ;;  %942 = vst.msk [vmem:[%s2433_s2 + $0x98] sm:$0xf] %vm903_vm0, %v1481_v8  ;;  %v977_v19 = vsel %vm969_vm1, %v408_v7, 0.0  ;;  %v1479_v25 = vpack.c.bf16 %v1870_v9, %v1870_v9 }
  0xfc   :  { %v1175_v14 = vadd.f32 %v1174_v10, %v1173_v6  ;;  %v976_v15 = vadd.f32 %v975_v11, %v974_v5  ;;  %v1570_v16 = vpop.f32.mrf.mxu0  ;;  %v1882_v17 = vpop.f32.mrf.mxu1  ;;  %v1182_v46 = vsel %vm969_vm1, %v1113_v21, 0.0 }
  0xfd   :  { %908 = vst.msk [vmem:[%s2433_s2 + $0x10] sm:$0xf] %vm903_vm0, %v1447_v12  ;;  %v1450_v20 = vpack.c.bf16 %v1570_v16, %v1570_v16  ;;  %v1178_v27 = vsel %vm969_vm1, %v1111_v13, 0.0  ;;  %940 = vst.msk [vmem:[%s2433_s2 + $0x90] sm:$0xf] %vm903_vm0, %v1479_v25  ;;  %v1114_v36 = vmul.f32 %v1570_v16, %v1570_v16  ;;  %v1482_v43 = vpack.c.bf16 %v1882_v17, %v1882_v17 }
  0xfe   :  { %v978_v22 = vadd.f32 %v977_v19, %v976_v15  ;;  %v1177_v23 = vadd.f32 %v1176_v18, %v1175_v14  ;;  %v411_v24 = vpop.f32.mrf.mxu0  ;;  %v1892_v26 = vpop.f32.mrf.mxu1  ;;  %v983_v47 = vsel %vm969_vm1, %v1570_v16, 0.0 }
  0xff   :  { %911 = vst.msk [vmem:[%s2433_s2 + $0x1c] sm:$0xf] %vm903_vm0, %v1450_v20  ;;  %v1448_v28 = vpack.c.bf16 %v411_v24, %v411_v24  ;;  %v979_v29 = vsel %vm969_vm1, %v411_v24, 0.0  ;;  %v1112_v30 = vmul.f32 %v411_v24, %v411_v24  ;;  %943 = vst.msk [vmem:[%s2433_s2 + $0x9c] sm:$0xf] %vm903_vm0, %v1482_v43  ;;  %v1184_v56 = vsel %vm969_vm1, %v1114_v36, 0.0 }
 0x100   :  { %v1179_v31 = vadd.f32 %v1178_v27, %v1177_v23  ;;  %v980_v32 = vadd.f32 %v979_v29, %v978_v22  ;;  %v1573_v33 = vpop.f32.mrf.mxu0  ;;  %v1904_v34 = vpop.f32.mrf.mxu1  ;;  %v1480_v63 = vpack.c.bf16 %v1892_v26, %v1892_v26 }
 0x101   :  { %909 = vst.msk [vmem:[%s2433_s2 + $0x14] sm:$0xf] %vm903_vm0, %v1448_v28  ;;  %v1180_v37 = vsel %vm969_vm1, %v1112_v30, 0.0  ;;  %v1453_v38 = vpack.c.bf16 %v1573_v33, %v1573_v33  ;;  %v1117_v59 = vmul.f32 %v1573_v33, %v1573_v33  ;;  %v989_v11 = vsel %vm969_vm1, %v1573_v33, 0.0 }
 0x102   :  { %v982_v39 = vadd.f32 %v981_v35, %v980_v32  ;;  %v1181_v40 = vadd.f32 %v1180_v37, %v1179_v31  ;;  %v424_v42 = vpop.f32.mrf.mxu0  ;;  %v1914_v44 = vpop.f32.mrf.mxu1  ;;  %941 = vst.msk [vmem:[%s2433_s2 + $0x94] sm:$0xf] %vm903_vm0, %v1480_v63  ;;  %v1485_v19 = vpack.c.bf16 %v1904_v34, %v1904_v34 }
 0x103   :  { %914 = vst.msk [vmem:[%s2433_s2 + $0x28] sm:$0xf] %vm903_vm0, %v1453_v38  ;;  %v1451_v48 = vpack.c.bf16 %v424_v42, %v424_v42  ;;  %v1115_v50 = vmul.f32 %v424_v42, %v424_v42  ;;  %v985_v57 = vsel %vm969_vm1, %v424_v42, 0.0  ;;  %v1190_v21 = vsel %vm969_vm1, %v1117_v59, 0.0 }
 0x104   :  { %v1183_v51 = vadd.f32 %v1182_v46, %v1181_v40  ;;  %v984_v52 = vadd.f32 %v983_v47, %v982_v39  ;;  %v1574_v53 = vpop.f32.mrf.mxu0  ;;  %v1926_v54 = vpop.f32.mrf.mxu1  ;;  %946 = vst.msk [vmem:[%s2433_s2 + $0xa8] sm:$0xf] %vm903_vm0, %v1485_v19  ;;  %v1483_v38 = vpack.c.bf16 %v1914_v44, %v1914_v44 }
 0x105   :  { %912 = vst.msk [vmem:[%s2433_s2 + $0x20] sm:$0xf] %vm903_vm0, %v1451_v48  ;;  %v1454_v58 = vpack.c.bf16 %v1574_v53, %v1574_v53  ;;  %v1186_v2 = vsel %vm969_vm1, %v1115_v50, 0.0  ;;  %v1118_v12 = vmul.f32 %v1574_v53, %v1574_v53  ;;  %v991_v22 = vsel %vm969_vm1, %v1574_v53, 0.0 }
 0x106   :  { %v986_v60 = vadd.f32 %v985_v57, %v984_v52  ;;  %v1185_v61 = vadd.f32 %v1184_v56, %v1183_v51  ;;  %v427_v62 = vpop.f32.mrf.mxu0  ;;  %v1936_v1 = vpop.f32.mrf.mxu1  ;;  %944 = vst.msk [vmem:[%s2433_s2 + $0xa0] sm:$0xf] %vm903_vm0, %v1483_v38 }
 0x107   :  { %915 = vst.msk [vmem:[%s2433_s2 + $0x2c] sm:$0xf] %vm903_vm0, %v1454_v58  ;;  %v1452_v3 = vpack.c.bf16 %v427_v62, %v427_v62  ;;  %v987_v4 = vsel %vm969_vm1, %v427_v62, 0.0  ;;  %v1116_v5 = vmul.f32 %v427_v62, %v427_v62  ;;  %v1192_v30 = vsel %vm969_vm1, %v1118_v12, 0.0 }
 0x108   :  { %v1187_v6 = vadd.f32 %v1186_v2, %v1185_v61  ;;  %v988_v7 = vadd.f32 %v987_v4, %v986_v60  ;;  %v1577_v8 = vpop.f32.mrf.mxu0  ;;  %v1948_v10 = vpop.f32.mrf.mxu1  ;;  %v1486_v61 = vpack.c.bf16 %v1926_v54, %v1926_v54  ;;  %v1484_v19 = vpack.c.bf16 %v1936_v1, %v1936_v1 }
 0x109   :  { %913 = vst.msk [vmem:[%s2433_s2 + $0x24] sm:$0xf] %vm903_vm0, %v1452_v3  ;;  %v1188_v13 = vsel %vm969_vm1, %v1116_v5, 0.0  ;;  %v1457_v14 = vpack.c.bf16 %v1577_v8, %v1577_v8  ;;  %v1121_v33 = vmul.f32 %v1577_v8, %v1577_v8  ;;  %v997_v52 = vsel %vm969_vm1, %v1577_v8, 0.0 }
 0x10a   :  { %v990_v15 = vadd.f32 %v989_v11, %v988_v7  ;;  %v1189_v16 = vadd.f32 %v1188_v13, %v1187_v6  ;;  %v440_v18 = vpop.f32.mrf.mxu0  ;;  %v1958_v20 = vpop.f32.mrf.mxu1  ;;  %947 = vst.msk [vmem:[%s2433_s2 + $0xac] sm:$0xf] %vm903_vm0, %v1486_v61  ;;  %945 = vst.msk [vmem:[%s2433_s2 + $0xa4] sm:$0xf] %vm903_vm0, %v1484_v19 }
 0x10b   :  { %918 = vst.msk [vmem:[%s2433_s2 + $0x38] sm:$0xf] %vm903_vm0, %v1457_v14  ;;  %v1455_v23 = vpack.c.bf16 %v440_v18, %v440_v18  ;;  %v1119_v24 = vmul.f32 %v440_v18, %v440_v18  ;;  %v993_v31 = vsel %vm969_vm1, %v440_v18, 0.0  ;;  %v1198_v63 = vsel %vm969_vm1, %v1121_v33, 0.0 }
 0x10c   :  { %v1191_v25 = vadd.f32 %v1190_v21, %v1189_v16  ;;  %v992_v27 = vadd.f32 %v991_v22, %v990_v15  ;;  %v1578_v28 = vpop.f32.mrf.mxu0  ;;  %v1970_v29 = vpop.f32.mrf.mxu1 }
 0x10d   :  { %916 = vst.msk [vmem:[%s2433_s2 + $0x30] sm:$0xf] %vm903_vm0, %v1455_v23  ;;  %v1458_v32 = vpack.c.bf16 %v1578_v28, %v1578_v28  ;;  %v1194_v40 = vsel %vm969_vm1, %v1119_v24, 0.0  ;;  %v1122_v53 = vmul.f32 %v1578_v28, %v1578_v28  ;;  %v999_v2 = vsel %vm969_vm1, %v1578_v28, 0.0 }
 0x10e   :  { %v994_v35 = vadd.f32 %v993_v31, %v992_v27  ;;  %v1193_v36 = vadd.f32 %v1192_v30, %v1191_v25  ;;  %v443_v37 = vpop.f32.mrf.mxu0  ;;  %v1980_v39 = vpop.f32.mrf.mxu1 }
 0x10f   :  { %919 = vst.msk [vmem:[%s2433_s2 + $0x3c] sm:$0xf] %vm903_vm0, %v1458_v32  ;;  %v1456_v42 = vpack.c.bf16 %v443_v37, %v443_v37  ;;  %v995_v43 = vsel %vm969_vm1, %v443_v37, 0.0  ;;  %v1120_v46 = vmul.f32 %v443_v37, %v443_v37  ;;  %v1200_v11 = vsel %vm969_vm1, %v1122_v53, 0.0 }
 0x110   :  { %v1195_v47 = vadd.f32 %v1194_v40, %v1193_v36  ;;  %v996_v48 = vadd.f32 %v995_v43, %v994_v35  ;;  %v1581_v50 = vpop.f32.mrf.mxu0  ;;  %v1992_v51 = vpop.f32.mrf.mxu1 }
 0x111   :  { %917 = vst.msk [vmem:[%s2433_s2 + $0x34] sm:$0xf] %vm903_vm0, %v1456_v42  ;;  %v1196_v56 = vsel %vm969_vm1, %v1120_v46, 0.0  ;;  %v1461_v57 = vpack.c.bf16 %v1581_v50, %v1581_v50  ;;  %v1125_v14 = vmul.f32 %v1581_v50, %v1581_v50  ;;  %v1005_v32 = vsel %vm969_vm1, %v1581_v50, 0.0 }
 0x112   :  { %v998_v58 = vadd.f32 %v997_v52, %v996_v48  ;;  %v1197_v59 = vadd.f32 %v1196_v56, %v1195_v47  ;;  %v456_v60 = vpop.f32.mrf.mxu0  ;;  %v2002_v62 = vpop.f32.mrf.mxu1  ;;  %v1489_v42 = vpack.c.bf16 %v1948_v10, %v1948_v10 }
 0x113   :  { %922 = vst.msk [vmem:[%s2433_s2 + $0x48] sm:$0xf] %vm903_vm0, %v1461_v57  ;;  %v1459_v3 = vpack.c.bf16 %v456_v60, %v456_v60  ;;  %v1123_v4 = vmul.f32 %v456_v60, %v456_v60  ;;  %v1001_v12 = vsel %vm969_vm1, %v456_v60, 0.0  ;;  %v1206_v46 = vsel %vm969_vm1, %v1125_v14, 0.0 }
 0x114   :  { %v1199_v5 = vadd.f32 %v1198_v63, %v1197_v59  ;;  %v1000_v6 = vadd.f32 %v999_v2, %v998_v58  ;;  %v1582_v7 = vpop.f32.mrf.mxu0  ;;  %v2014_v8 = vpop.f32.mrf.mxu1  ;;  %950 = vst.msk [vmem:[%s2433_s2 + $0xb8] sm:$0xf] %vm903_vm0, %v1489_v42 }
 0x115   :  { %920 = vst.msk [vmem:[%s2433_s2 + $0x40] sm:$0xf] %vm903_vm0, %v1459_v3  ;;  %v1462_v13 = vpack.c.bf16 %v1582_v7, %v1582_v7  ;;  %v1202_v22 = vsel %vm969_vm1, %v1123_v4, 0.0  ;;  %v1126_v33 = vmul.f32 %v1582_v7, %v1582_v7  ;;  %v1007_v47 = vsel %vm969_vm1, %v1582_v7, 0.0 }
 0x116   :  { %v1002_v15 = vadd.f32 %v1001_v12, %v1000_v6  ;;  %v1201_v16 = vadd.f32 %v1200_v11, %v1199_v5  ;;  %v459_v18 = vpop.f32.mrf.mxu0  ;;  %v2024_v21 = vpop.f32.mrf.mxu1  ;;  %v1487_v4 = vpack.c.bf16 %v1958_v20, %v1958_v20 }
 0x117   :  { %923 = vst.msk [vmem:[%s2433_s2 + $0x4c] sm:$0xf] %vm903_vm0, %v1462_v13  ;;  %v1460_v23 = vpack.c.bf16 %v459_v18, %v459_v18  ;;  %v1003_v24 = vsel %vm969_vm1, %v459_v18, 0.0  ;;  %v1124_v25 = vmul.f32 %v459_v18, %v459_v18  ;;  %v1208_v58 = vsel %vm969_vm1, %v1126_v33, 0.0 }
 0x118   :  { %v1203_v27 = vadd.f32 %v1202_v22, %v1201_v16  ;;  %v1004_v28 = vadd.f32 %v1003_v24, %v1002_v15  ;;  %v1585_v30 = vpop.f32.mrf.mxu0  ;;  %v2036_v31 = vpop.f32.mrf.mxu1  ;;  %948 = vst.msk [vmem:[%s2433_s2 + $0xb0] sm:$0xf] %vm903_vm0, %v1487_v4 }
 0x119   :  { %921 = vst.msk [vmem:[%s2433_s2 + $0x44] sm:$0xf] %vm903_vm0, %v1460_v23  ;;  %v1204_v35 = vsel %vm969_vm1, %v1124_v25, 0.0  ;;  %v1465_v36 = vpack.c.bf16 %v1585_v30, %v1585_v30  ;;  %v1129_v61 = vmul.f32 %v1585_v30, %v1585_v30  ;;  %v1013_v16 = vsel %vm969_vm1, %v1585_v30, 0.0 }
 0x11a   :  { %v1006_v37 = vadd.f32 %v1005_v32, %v1004_v28  ;;  %v1205_v38 = vadd.f32 %v1204_v35, %v1203_v27  ;;  %v472_v40 = vpop.f32.mrf.mxu0  ;;  %v2046_v43 = vpop.f32.mrf.mxu1  ;;  %v1490_v27 = vpack.c.bf16 %v1970_v29, %v1970_v29 }
 0x11b   :  { %926 = vst.msk [vmem:[%s2433_s2 + $0x58] sm:$0xf] %vm903_vm0, %v1465_v36  ;;  %v1463_v48 = vpack.c.bf16 %v472_v40, %v472_v40  ;;  %v1127_v50 = vmul.f32 %v472_v40, %v472_v40  ;;  %v1009_v59 = vsel %vm969_vm1, %v472_v40, 0.0  ;;  %v1214_v28 = vsel %vm969_vm1, %v1129_v61, 0.0 }
 0x11c   :  { %v1207_v52 = vadd.f32 %v1206_v46, %v1205_v38  ;;  %v1008_v53 = vadd.f32 %v1007_v47, %v1006_v37  ;;  %v1586_v56 = vpop.f32.mrf.mxu0  ;;  %v2058_v57 = vpop.f32.mrf.mxu1  ;;  %951 = vst.msk [vmem:[%s2433_s2 + $0xbc] sm:$0xf] %vm903_vm0, %v1490_v27 }
 0x11d   :  { %924 = vst.msk [vmem:[%s2433_s2 + $0x50] sm:$0xf] %vm903_vm0, %v1463_v48  ;;  %v1466_v60 = vpack.c.bf16 %v1586_v56, %v1586_v56  ;;  %v1210_v5 = vsel %vm969_vm1, %v1127_v50, 0.0  ;;  %v1130_v18 = vmul.f32 %v1586_v56, %v1586_v56  ;;  %v1015_v32 = vsel %vm969_vm1, %v1586_v56, 0.0 }
 0x11e   :  { %v1010_v63 = vadd.f32 %v1009_v59, %v1008_v53  ;;  %v1209_v2 = vadd.f32 %v1208_v58, %v1207_v52  ;;  %v475_v3 = vpop.f32.mrf.mxu0  ;;  %v2074_v12 = vpop.f32.mrf.mxu1  ;;  %v1488_v53 = vpack.c.bf16 %v1980_v39, %v1980_v39 }
 0x11f   :  { %927 = vst.msk [vmem:[%s2433_s2 + $0x5c] sm:$0xf] %vm903_vm0, %v1466_v60  ;;  %v1464_v6 = vpack.c.bf16 %v475_v3, %v475_v3  ;;  %v1011_v7 = vsel %vm969_vm1, %v475_v3, 0.0  ;;  %v1128_v11 = vmul.f32 %v475_v3, %v475_v3  ;;  %v1216_v40 = vsel %vm969_vm1, %v1130_v18, 0.0 }
 0x120   :  { %v1211_v13 = vadd.f32 %v1210_v5, %v1209_v2  ;;  %v1012_v14 = vadd.f32 %v1011_v7, %v1010_v63  ;;  %v1589_v15 = vpop.f32.mrf.mxu0  ;;  %v2094_v35 = vpop.f32.mrf.mxu1  ;;  %949 = vst.msk [vmem:[%s2433_s2 + $0xb4] sm:$0xf] %vm903_vm0, %v1488_v53 }
 0x121   :  { %925 = vst.msk [vmem:[%s2433_s2 + $0x54] sm:$0xf] %vm903_vm0, %v1464_v6  ;;  %v1212_v19 = vsel %vm969_vm1, %v1128_v11, 0.0  ;;  %v1469_v22 = vpack.c.bf16 %v1589_v15, %v1589_v15  ;;  %v1133_v47 = vmul.f32 %v1589_v15, %v1589_v15  ;;  %v1021_v4 = vsel %vm969_vm1, %v1589_v15, 0.0 }
 0x122   :  { %v1014_v23 = vadd.f32 %v1013_v16, %v1012_v14  ;;  %v1213_v24 = vadd.f32 %v1212_v19, %v1211_v13  ;;  %v488_v25 = vpop.f32.mrf.mxu0  ;;  %v2114_v61 = vpop.f32.mrf.mxu1  ;;  %v1493_v16 = vpack.c.bf16 %v1992_v51, %v1992_v51 }
 0x123   :  { %930 = vst.msk [vmem:[%s2433_s2 + $0x68] sm:$0xf] %vm903_vm0, %v1469_v22  ;;  %v1467_v30 = vpack.c.bf16 %v488_v25, %v488_v25  ;;  %v1131_v33 = vmul.f32 %v488_v25, %v488_v25  ;;  %v1017_v42 = vsel %vm969_vm1, %v488_v25, 0.0  ;;  %v1222_v18 = vsel %vm969_vm1, %v1133_v47, 0.0 }
 0x124   :  { %v1215_v36 = vadd.f32 %v1214_v28, %v1213_v24  ;;  %v1016_v37 = vadd.f32 %v1015_v32, %v1014_v23  ;;  %v1590_v38 = vpop.f32.mrf.mxu0  ;;  %v2134_v23 = vpop.f32.mrf.mxu1  ;;  %954 = vst.msk [vmem:[%s2433_s2 + $0xc8] sm:$0xf] %vm903_vm0, %v1493_v16 }
 0x125   :  { %928 = vst.msk [vmem:[%s2433_s2 + $0x60] sm:$0xf] %vm903_vm0, %v1467_v30  ;;  %v1470_v46 = vpack.c.bf16 %v1590_v38, %v1590_v38  ;;  %v1218_v56 = vsel %vm969_vm1, %v1131_v33, 0.0  ;;  %v1134_v5 = vmul.f32 %v1590_v38, %v1590_v38  ;;  %v1023_v19 = vsel %vm969_vm1, %v1590_v38, 0.0 }
 0x126   :  { %v1018_v48 = vadd.f32 %v1017_v42, %v1016_v37  ;;  %v1217_v50 = vadd.f32 %v1216_v40, %v1215_v36  ;;  %v491_v52 = vpop.f32.mrf.mxu0  ;;  %v1491_v40 = vpack.c.bf16 %v2002_v62, %v2002_v62 }
 0x127   :  { %931 = vst.msk [vmem:[%s2433_s2 + $0x6c] sm:$0xf] %vm903_vm0, %v1470_v46  ;;  %v1468_v58 = vpack.c.bf16 %v491_v52, %v491_v52  ;;  %v1019_v59 = vsel %vm969_vm1, %v491_v52, 0.0  ;;  %v1132_v60 = vmul.f32 %v491_v52, %v491_v52  ;;  %v1224_v28 = vsel %vm969_vm1, %v1134_v5, 0.0 }
 0x128   :  { %v1219_v63 = vadd.f32 %v1218_v56, %v1217_v50  ;;  %v1020_v2 = vadd.f32 %v1019_v59, %v1018_v48  ;;  %v1593_v3 = vpop.f32.mrf.mxu0  ;;  %v2154_v50 = vpop.f32.mrf.mxu1  ;;  %952 = vst.msk [vmem:[%s2433_s2 + $0xc0] sm:$0xf] %vm903_vm0, %v1491_v40  ;;  %v1501_v40 = vpack.c.bf16 %v2094_v35, %v2094_v35 }
 0x129   :  { %929 = vst.msk [vmem:[%s2433_s2 + $0x64] sm:$0xf] %vm903_vm0, %v1468_v58  ;;  %v1220_v6 = vsel %vm969_vm1, %v1132_v60, 0.0  ;;  %v1473_v7 = vpack.c.bf16 %v1593_v3, %v1593_v3  ;;  %v1137_v33 = vmul.f32 %v1593_v3, %v1593_v3  ;;  %v1029_v56 = vsel %vm969_vm1, %v1593_v3, 0.0 }
 0x12a   :  { %v1022_v11 = vadd.f32 %v1021_v4, %v1020_v2  ;;  %v1221_v13 = vadd.f32 %v1220_v6, %v1219_v63  ;;  %v504_v14 = vpop.f32.mrf.mxu0  ;;  %v1494_v60 = vpack.c.bf16 %v2014_v8, %v2014_v8  ;;  %v1492_v4 = vpack.c.bf16 %v2024_v21, %v2024_v21  ;;  %962 = vst.msk [vmem:[%s2433_s2 + $0xe8] sm:$0xf] %vm903_vm0, %v1501_v40 }
 0x12b   :  { %934 = vst.msk [vmem:[%s2433_s2 + $0x78] sm:$0xf] %vm903_vm0, %v1473_v7  ;;  %v1471_v15 = vpack.c.bf16 %v504_v14, %v504_v14  ;;  %v1135_v22 = vmul.f32 %v504_v14, %v504_v14  ;;  %v1025_v32 = vsel %vm969_vm1, %v504_v14, 0.0  ;;  %v1230_v5 = vsel %vm969_vm1, %v1137_v33, 0.0 }
 0x12c   :  { %v1223_v24 = vadd.f32 %v1222_v18, %v1221_v13  ;;  %v1024_v25 = vadd.f32 %v1023_v19, %v1022_v11  ;;  %v1594_v27 = vpop.f32.mrf.mxu0  ;;  %v1139_v6 = vmul.f32 %v1817_v45, %v1817_v45  ;;  %955 = vst.msk [vmem:[%s2433_s2 + $0xcc] sm:$0xf] %vm903_vm0, %v1494_v60  ;;  %v1497_v7 = vpack.c.bf16 %v2036_v31, %v2036_v31  ;;  %v2180_v11 = vpop.f32.mrf.mxu1 }
 0x12d   :  { %932 = vst.msk [vmem:[%s2433_s2 + $0x70] sm:$0xf] %vm903_vm0, %v1471_v15  ;;  %v1474_v30 = vpack.c.bf16 %v1594_v27, %v1594_v27  ;;  %v1226_v42 = vsel %vm969_vm1, %v1135_v22, 0.0  ;;  %v1138_v58 = vmul.f32 %v1594_v27, %v1594_v27  ;;  %v1031_v3 = vsel %vm969_vm1, %v1594_v27, 0.0  ;;  %953 = vst.msk [vmem:[%s2433_s2 + $0xc4] sm:$0xf] %vm903_vm0, %v1492_v4 }
 0x12e   :  { %v1026_v36 = vadd.f32 %v1025_v32, %v1024_v25  ;;  %v1225_v37 = vadd.f32 %v1224_v28, %v1223_v24  ;;  %v507_v38 = vpop.f32.mrf.mxu0  ;;  %v1033_v18 = vsel %vm969_vm1, %v1817_v45, 0.0  ;;  %v1140_v19 = vmul.f32 %v1841_v55, %v1841_v55  ;;  %958 = vst.msk [vmem:[%s2433_s2 + $0xd8] sm:$0xf] %vm903_vm0, %v1497_v7 }
 0x12f   :  { %935 = vst.msk [vmem:[%s2433_s2 + $0x7c] sm:$0xf] %vm903_vm0, %v1474_v30  ;;  %v1472_v46 = vpack.c.bf16 %v507_v38, %v507_v38  ;;  %v1027_v47 = vsel %vm969_vm1, %v507_v38, 0.0  ;;  %v1136_v48 = vmul.f32 %v507_v38, %v507_v38  ;;  %v1232_v16 = vsel %vm969_vm1, %v1138_v58, 0.0  ;;  %v2210_v30 = vpop.f32.mrf.mxu1 }
 0x130   :  { %v1227_v52 = vadd.f32 %v1226_v42, %v1225_v37  ;;  %v1028_v53 = vadd.f32 %v1027_v47, %v1026_v36  ;;  %v1495_v15 = vpack.c.bf16 %v2046_v43, %v2046_v43  ;;  %v1498_v25 = vpack.c.bf16 %v2058_v57, %v2058_v57 }
 0x131   :  { %933 = vst.msk [vmem:[%s2433_s2 + $0x74] sm:$0xf] %vm903_vm0, %v1472_v46  ;;  %v1228_v59 = vsel %vm969_vm1, %v1136_v48, 0.0  ;;  %v1141_v27 = vmul.f32 %v1813_v41, %v1813_v41  ;;  %v1234_v45 = vsel %vm969_vm1, %v1139_v6, 0.0  ;;  %v1035_v28 = vsel %vm969_vm1, %v1841_v55, 0.0 }
 0x132   :  { %v1030_v63 = vadd.f32 %v1029_v56, %v1028_v53  ;;  %v1229_v2 = vadd.f32 %v1228_v59, %v1227_v52  ;;  %956 = vst.msk [vmem:[%s2433_s2 + $0xd0] sm:$0xf] %vm903_vm0, %v1495_v15  ;;  %v1496_v32 = vpack.c.bf16 %v2074_v12, %v2074_v12  ;;  %959 = vst.msk [vmem:[%s2433_s2 + $0xdc] sm:$0xf] %vm903_vm0, %v1498_v25  ;;  %v1037_v55 = vsel %vm969_vm1, %v1813_v41, 0.0  ;;  %v2240_v56 = vpop.f32.mrf.mxu1 }
 0x133   :  { %v1142_v37 = vmul.f32 %v1829_v49, %v1829_v49  ;;  %v1236_v38 = vsel %vm969_vm1, %v1140_v19, 0.0  ;;  %v1499_v47 = vpack.c.bf16 %v2114_v61, %v2114_v61  ;;  %v1238_v41 = vsel %vm969_vm1, %v1141_v27, 0.0 }
 0x134   :  { %v1032_v13 = vadd.f32 %v1031_v3, %v1030_v63  ;;  %v1231_v14 = vadd.f32 %v1230_v5, %v1229_v2  ;;  %957 = vst.msk [vmem:[%s2433_s2 + $0xd4] sm:$0xf] %vm903_vm0, %v1496_v32  ;;  %v1039_v48 = vsel %vm969_vm1, %v1829_v49, 0.0  ;;  %v1143_v52 = vmul.f32 %v1870_v9, %v1870_v9 }
 0x135   :  { %v1502_v53 = vpack.c.bf16 %v2134_v23, %v2134_v23  ;;  %960 = vst.msk [vmem:[%s2433_s2 + $0xe0] sm:$0xf] %vm903_vm0, %v1499_v47  ;;  %v1240_v49 = vsel %vm969_vm1, %v1142_v37, 0.0  ;;  %v1041_v60 = vsel %vm969_vm1, %v1870_v9, 0.0  ;;  %v1144_v63 = vmul.f32 %v1892_v26, %v1892_v26 }
 0x136   :  { %v1233_v22 = vadd.f32 %v1232_v16, %v1231_v14  ;;  %v1034_v24 = vadd.f32 %v1033_v18, %v1032_v13  ;;  %v1500_v2 = vpack.c.bf16 %v2154_v50, %v2154_v50  ;;  %v1505_v3 = vpack.c.bf16 %v2180_v11, %v2180_v11  ;;  %v2270_v14 = vpop.f32.mrf.mxu1 }
 0x137   :  { %963 = vst.msk [vmem:[%s2433_s2 + $0xec] sm:$0xf] %vm903_vm0, %v1502_v53  ;;  %v1145_v6 = vmul.f32 %v1856_v0, %v1856_v0  ;;  %v1242_v9 = vsel %vm969_vm1, %v1143_v52, 0.0  ;;  %v1043_v7 = vsel %vm969_vm1, %v1892_v26, 0.0  ;;  %v1503_v13 = vpack.c.bf16 %v2210_v30, %v2210_v30 }
 0x138   :  { %v1036_v33 = vadd.f32 %v1035_v28, %v1034_v24  ;;  %v1235_v36 = vadd.f32 %v1234_v45, %v1233_v22  ;;  %961 = vst.msk [vmem:[%s2433_s2 + $0xe4] sm:$0xf] %vm903_vm0, %v1500_v2  ;;  %966 = vst.msk [vmem:[%s2433_s2 + $0xf8] sm:$0xf] %vm903_vm0, %v1505_v3  ;;  %v1045_v26 = vsel %vm969_vm1, %v1856_v0, 0.0  ;;  %v1146_v19 = vmul.f32 %v1882_v17, %v1882_v17 }
 0x139   :  { %v1244_v15 = vsel %vm969_vm1, %v1144_v63, 0.0  ;;  %964 = vst.msk [vmem:[%s2433_s2 + $0xf0] sm:$0xf] %vm903_vm0, %v1503_v13  ;;  %v1506_v22 = vpack.c.bf16 %v2240_v56, %v2240_v56  ;;  %v1504_v27 = vpack.c.bf16 %v2270_v14, %v2270_v14  ;;  %v1246_v0 = vsel %vm969_vm1, %v1145_v6, 0.0 }
 0x13a   :  { %v1038_v42 = vadd.f32 %v1037_v55, %v1036_v33  ;;  %v1237_v46 = vadd.f32 %v1236_v38, %v1235_v36  ;;  %v1047_v45 = vsel %vm969_vm1, %v1882_v17, 0.0  ;;  %v1147_v28 = vmul.f32 %v1914_v44, %v1914_v44 }
 0x13b   :  { %967 = vst.msk [vmem:[%s2433_s2 + $0xfc] sm:$0xf] %vm903_vm0, %v1506_v22  ;;  %965 = vst.msk [vmem:[%s2433_s2 + $0xf4] sm:$0xf] %vm903_vm0, %v1504_v27  ;;  %v1248_v36 = vsel %vm969_vm1, %v1146_v19, 0.0  ;;  %v1049_v17 = vsel %vm969_vm1, %v1914_v44, 0.0  ;;  %v1148_v55 = vmul.f32 %v1936_v1, %v1936_v1  ;;  %v1150_v52 = vmul.f32 %v1926_v54, %v1926_v54 }
 0x13c   :  { %v1239_v58 = vadd.f32 %v1238_v41, %v1237_v46  ;;  %v1040_v59 = vadd.f32 %v1039_v48, %v1038_v42  ;;  %v1758_v37 = vmov 0.0   ;;  %v1149_v42 = vmul.f32 %v1904_v34, %v1904_v34  ;;  %s1759_s2 = smov [#allocation5]  }
 0x13d   :  { %36 = vst.msk [vmem:[#allocation5] sm:$0x1] %vm35_vm2, %v1758_v37  ;;  %37 = vst.msk [vmem:[#allocation6] sm:$0x1] %vm35_vm2, %v1758_v37  ;;  %v1250_v46 = vsel %vm969_vm1, %v1147_v28, 0.0  ;;  %v1051_v47 = vsel %vm969_vm1, %v1936_v1, 0.0  ;;  %v1151_v1 = vmul.f32 %v1958_v20, %v1958_v20 }
 0x13e   :  { %v1042_v4 = vadd.f32 %v1041_v60, %v1040_v59  ;;  %v1241_v5 = vadd.f32 %v1240_v49, %v1239_v58  ;;  %v1053_v48 = vsel %vm969_vm1, %v1904_v34, 0.0  ;;  %v1252_v53 = vsel %vm969_vm1, %v1148_v55, 0.0  ;;  %s1314_s26 = sshll.u32 %s1759_s2, 4  ;;  %s1315_s26 = int_to_ptr.vmem [resolvable:$true] %s1314_s26 }
 0x13f   :  { %v1254_v49 = vsel %vm969_vm1, %v1149_v42, 0.0  ;;  %v1055_v60 = vsel %vm969_vm1, %v1926_v54, 0.0  ;;  %v1057_v34 = vsel %vm969_vm1, %v1958_v20, 0.0  ;;  %v1258_v54 = vsel %vm969_vm1, %v1151_v1, 0.0  ;;  %s1709_s28 = scalar_lea.vmem %s1315_s26, 16  ;;  %s1713_s29 = scalar_lea.vmem %s1315_s26, 32 }
 0x140   :  { %v1243_v16 = vadd.f32 %v1242_v9, %v1241_v5  ;;  %v1044_v18 = vadd.f32 %v1043_v7, %v1042_v4  ;;  %v1256_v4 = vsel %vm969_vm1, %v1150_v52, 0.0  ;;  %v1152_v5 = vmul.f32 %v1980_v39, %v1980_v39  ;;  %p1710_p5 = scmp.ne.s32.totalorder %s1315_s26, %s1709_s28  ;;  %p1714_p6 = scmp.lt.s32.totalorder %s1315_s26, %s1315_s26 }
 0x141   :  { %v1153_v9 = vmul.f32 %v1948_v10, %v1948_v10  ;;  %v1059_v7 = vsel %vm969_vm1, %v1980_v39, 0.0  ;;  %v1154_v20 = vmul.f32 %v1970_v29, %v1970_v29  ;;  %v1155_v39 = vmul.f32 %v2002_v62, %v2002_v62  ;;  %p1715_p7 = scmp.lt.s32.totalorder %s1713_s29, %s1709_s28 }
 0x142   :  { %v1046_v24 = vadd.f32 %v1045_v26, %v1044_v18  ;;  %v1245_v25 = vadd.f32 %v1244_v15, %v1243_v16  ;;  %v1061_v18 = vsel %vm969_vm1, %v1948_v10, 0.0  ;;  %v1260_v26 = vsel %vm969_vm1, %v1152_v5, 0.0 }
 0x143   :  { %v1262_v22 = vsel %vm969_vm1, %v1153_v9, 0.0  ;;  %v1065_v10 = vsel %vm969_vm1, %v2002_v62, 0.0  ;;  %v1069_v37 = vsel %vm969_vm1, %v1992_v51, 0.0  ;;  %v1158_v62 = vmul.f32 %v2014_v8, %v2014_v8  ;;  %p1716_p8 = por %p1715_p7, %p1714_p6 }
 0x144   :  { %v1247_v32 = vadd.f32 %v1246_v0, %v1245_v25  ;;  %v1048_v33 = vadd.f32 %v1047_v45, %v1046_v24  ;;  %v1063_v24 = vsel %vm969_vm1, %v1970_v29, 0.0  ;;  %v1264_v0 = vsel %vm969_vm1, %v1154_v20, 0.0 }
 0x145   :  { %v1156_v45 = vmul.f32 %v2024_v21, %v2024_v21  ;;  %v1266_v29 = vsel %vm969_vm1, %v1155_v39, 0.0  ;;  %v1160_v52 = vmul.f32 %v2074_v12, %v2074_v12  ;;  %v1083_v20 = vsel %vm969_vm1, %v2154_v50, 0.0  ;;  %p1717_p9 = pnand %p1716_p8, %p1710_p5 }
 0x146   :  { %v1050_v38 = vadd.f32 %v1049_v17, %v1048_v33  ;;  %v1249_v40 = vadd.f32 %v1248_v36, %v1247_v32  ;;  %v1157_v33 = vmul.f32 %v1992_v51, %v1992_v51  ;;  %v1067_v36 = vsel %vm969_vm1, %v2024_v21, 0.0 }
 0x147   :  { %v1159_v21 = vmul.f32 %v2046_v43, %v2046_v43  ;;  %v1073_v51 = vsel %vm969_vm1, %v2046_v43, 0.0  ;;  %v1162_v43 = vmul.f32 %v2058_v57, %v2058_v57 }
 0x148   :  { %v1251_v41 = vadd.f32 %v1250_v46, %v1249_v40  ;;  %v1052_v44 = vadd.f32 %v1051_v47, %v1050_v38  ;;  %v1268_v38 = vsel %vm969_vm1, %v1156_v45, 0.0  ;;  %v1270_v46 = vsel %vm969_vm1, %v1157_v33, 0.0 }
 0x149   :  { %v1071_v47 = vsel %vm969_vm1, %v2014_v8, 0.0  ;;  %v1274_v8 = vsel %vm969_vm1, %v1159_v21, 0.0 }
 0x14a   :  { %v1054_v58 = vadd.f32 %v1053_v48, %v1052_v44  ;;  %v1253_v59 = vadd.f32 %v1252_v53, %v1251_v41  ;;  %v1272_v48 = vsel %vm969_vm1, %v1158_v62, 0.0 }
 0x14c   :  { %v1255_v63 = vadd.f32 %v1254_v49, %v1253_v59  ;;  %v1056_v2 = vadd.f32 %v1055_v60, %v1054_v58  ;;  %v1161_v59 = vmul.f32 %v2036_v31, %v2036_v31  ;;  %v1075_v49 = vsel %vm969_vm1, %v2074_v12, 0.0 }
 0x14d   :  { %v1163_v12 = vmul.f32 %v2114_v61, %v2114_v61 }
 0x14e   :  { %v1058_v3 = vadd.f32 %v1057_v34, %v1056_v2  ;;  %v1257_v6 = vadd.f32 %v1256_v4, %v1255_v63  ;;  %v1077_v63 = vsel %vm969_vm1, %v2036_v31, 0.0  ;;  %v1276_v2 = vsel %vm969_vm1, %v1160_v52, 0.0 }
 0x14f   :  { %v1278_v5 = vsel %vm969_vm1, %v1161_v59, 0.0  ;;  %v1081_v31 = vsel %vm969_vm1, %v2114_v61, 0.0  ;;  %v1166_v61 = vmul.f32 %v2134_v23, %v2134_v23 }
 0x150   :  { %v1259_v13 = vadd.f32 %v1258_v54, %v1257_v6  ;;  %v1060_v16 = vadd.f32 %v1059_v7, %v1058_v3  ;;  %v1079_v3 = vsel %vm969_vm1, %v2058_v57, 0.0  ;;  %v1280_v54 = vsel %vm969_vm1, %v1162_v43, 0.0 }
 0x151   :  { %v1164_v7 = vmul.f32 %v2154_v50, %v2154_v50  ;;  %v1282_v57 = vsel %vm969_vm1, %v1163_v12, 0.0  ;;  %v1167_v50 = vmul.f32 %v2210_v30, %v2210_v30  ;;  %v1288_v45 = vsel %vm969_vm1, %v1166_v61, 0.0 }
 0x152   :  { %v1062_v19 = vadd.f32 %v1061_v18, %v1060_v16  ;;  %v1261_v15 = vadd.f32 %v1260_v26, %v1259_v13  ;;  %v1165_v18 = vmul.f32 %v2094_v35, %v2094_v35 }
 0x154   :  { %v1263_v25 = vadd.f32 %v1262_v22, %v1261_v15  ;;  %v1064_v27 = vadd.f32 %v1063_v24, %v1062_v19  ;;  %v1085_v15 = vsel %vm969_vm1, %v2094_v35, 0.0  ;;  %v1284_v22 = vsel %vm969_vm1, %v1164_v7, 0.0 }
 0x155   :  { %v1089_v35 = vsel %vm969_vm1, %v2210_v30, 0.0  ;;  %v1170_v30 = vmul.f32 %v2240_v56, %v2240_v56 }
 0x156   :  { %v1066_v28 = vadd.f32 %v1065_v10, %v1064_v27  ;;  %v1265_v32 = vadd.f32 %v1264_v0, %v1263_v25  ;;  %v1286_v25 = vsel %vm969_vm1, %v1165_v18, 0.0  ;;  %v1087_v27 = vsel %vm969_vm1, %v2134_v23, 0.0 }
 0x157   :  { %v1290_v23 = vsel %vm969_vm1, %v1167_v50, 0.0 }
 0x158   :  { %v1267_v17 = vadd.f32 %v1266_v29, %v1265_v32  ;;  %v1068_v55 = vadd.f32 %v1067_v36, %v1066_v28  ;;  %v1168_v28 = vmul.f32 %v2270_v14, %v2270_v14  ;;  %v1169_v29 = vmul.f32 %v2180_v11, %v2180_v11 }
 0x159   :  { %v1091_v36 = vsel %vm969_vm1, %v2270_v14, 0.0  ;;  %v1296_v14 = vsel %vm969_vm1, %v1170_v30, 0.0 }
 0x15a   :  { %v1070_v40 = vadd.f32 %v1069_v37, %v1068_v55  ;;  %v1269_v42 = vadd.f32 %v1268_v38, %v1267_v17  ;;  %v1093_v37 = vsel %vm969_vm1, %v2180_v11, 0.0  ;;  %v1292_v62 = vsel %vm969_vm1, %v1168_v28, 0.0 }
 0x15c   :  { %v1271_v41 = vadd.f32 %v1270_v46, %v1269_v42  ;;  %v1072_v44 = vadd.f32 %v1071_v47, %v1070_v40  ;;  %v1294_v42 = vsel %vm969_vm1, %v1169_v29, 0.0  ;;  %v1095_v46 = vsel %vm969_vm1, %v2240_v56, 0.0  ;;  %v1106_v56 = vld [vmem:[#allocation6] sm:$0x1] }
 0x15e   :  { %v1074_v53 = vadd.f32 %v1073_v51, %v1072_v44  ;;  %v1273_v58 = vadd.f32 %v1272_v48, %v1271_v41 }
 0x160   :  { %v1275_v60 = vadd.f32 %v1274_v8, %v1273_v58  ;;  %v1076_v1 = vadd.f32 %v1075_v49, %v1074_v53  ;;  %v968_v49 = vld [vmem:[#allocation5] sm:$0x1] }
 0x162   :  { %v1078_v4 = vadd.f32 %v1077_v63, %v1076_v1  ;;  %v1277_v34 = vadd.f32 %v1276_v2, %v1275_v60 }
 0x164   :  { %v1279_v6 = vadd.f32 %v1278_v5, %v1277_v34  ;;  %v1080_v9 = vadd.f32 %v1079_v3, %v1078_v4 }
 0x166   :  { %v1082_v13 = vadd.f32 %v1081_v31, %v1080_v9  ;;  %v1281_v16 = vadd.f32 %v1280_v54, %v1279_v6 }
 0x168   :  { %v1283_v26 = vadd.f32 %v1282_v57, %v1281_v16  ;;  %v1084_v19 = vadd.f32 %v1083_v20, %v1082_v13 }
 0x16a   :  { %v1086_v24 = vadd.f32 %v1085_v15, %v1084_v19  ;;  %v1285_v39 = vadd.f32 %v1284_v22, %v1283_v26 }
 0x16c   :  { %v1287_v0 = vadd.f32 %v1286_v25, %v1285_v39  ;;  %v1088_v10 = vadd.f32 %v1087_v27, %v1086_v24 }
 0x16e   :  { %v1090_v32 = vadd.f32 %v1089_v35, %v1088_v10  ;;  %v1289_v33 = vadd.f32 %v1288_v45, %v1287_v0 }
 0x170   :  { %v1291_v17 = vadd.f32 %v1290_v23, %v1289_v33  ;;  %v1092_v55 = vadd.f32 %v1091_v36, %v1090_v32 }
 0x172   :  { %v1094_v38 = vadd.f32 %v1093_v37, %v1092_v55  ;;  %v1293_v40 = vadd.f32 %v1292_v62, %v1291_v17 }
 0x174   :  { %v1096_v47 = vadd.f32 %v1095_v46, %v1094_v38  ;;  %v1295_v21 = vadd.f32 %v1294_v42, %v1293_v40 }
 0x176   :  { %v1097_v41 = vrot.slane %v1096_v47, 4  ;;  %v1297_v44 = vadd.f32 %v1296_v14, %v1295_v21 }
 0x178   :  { %v1098_v48 = vadd.f32 %v1097_v41, %v1096_v47  ;;  %v1298_v11 = vrot.slane %v1297_v44, 4 }
 0x17a   :  { %v1099_v51 = vrot.slane %v1098_v48, 2  ;;  %v1299_v52 = vadd.f32 %v1298_v11, %v1297_v44 }
 0x17c   :  { %v1100_v53 = vadd.f32 %v1099_v51, %v1098_v48  ;;  %v1300_v58 = vrot.slane %v1299_v52, 2 }
 0x17e   :  { %v1101_v59 = vrot.slane %v1100_v53, 1  ;;  %v1301_v8 = vadd.f32 %v1300_v58, %v1299_v52 }
 0x180   :  { %v1102_v60 = vadd.f32 %v1101_v59, %v1100_v53  ;;  %v1302_v1 = vrot.slane %v1301_v8, 1 }
 0x182   :  { %v1103_v63 = vadd.f32 %v1102_v60, %v968_v49  ;;  %v1303_v43 = vadd.f32 %v1302_v1, %v1301_v8 }
 0x184   :  { %1105 = vst.msk [vmem:[#allocation5] sm:$0x1] %vm35_vm2, %v1103_v63  ;;  %v1304_v2 = vadd.f32 %v1303_v43, %v1106_v56 }
 0x185   :  { %1720 = shalt.err (!%p1717_p9)
}
 0x186   :  { %1317 = dma.vmem_to_hbm [thread:$0]  %s1315_s26, 16, %s2434_s3, [#allocation4]   ;;  %1305 = vst.msk [vmem:[#allocation6] sm:$0x1] %vm35_vm2, %v1304_v2 }
 0x187   :  { %s1729_s6 = scalar_lea.vmem %s1325_s0, 16  ;;  %s1733_s7 = scalar_lea.vmem %s1325_s0, 32 }
 0x188   :  { %p1730_p10 = scmp.ne.s32.totalorder %s1325_s0, %s1729_s6  ;;  %p1734_p11 = scmp.lt.s32.totalorder %s1325_s0, %s1325_s0 }
 0x189   :  { %p1735_p12 = scmp.lt.s32.totalorder %s1733_s7, %s1729_s6 }
 0x18b   :  { %p1736_p13 = por %p1735_p12, %p1734_p11 }
 0x18d   :  { %p1737_p0 = pnand %p1736_p13, %p1730_p10 }
 0x18f   :  { %1740 = shalt.err (!%p1737_p0)
}
 0x190   :  { %1327 = dma.vmem_to_hbm [thread:$0]  %s1325_s0, 16, %s2435_s4, [#allocation7]  }
 0x191   :  { %1751 = dma.done.wait [#allocation4], 16  }
 0x192   :  { %1752 = vsyncadd [#allocation4], 4294967280 }
 0x193   :  { %1753 = dma.done.wait [#allocation7], 16  }
 0x194   :  { %1754 = vsyncadd [#allocation7], 4294967280 }
 0x195   :  { %1336 = vsyncpa [#allocation3], 1 }
 0x196   :  { %1337 = vsyncpa [#allocation4], 1 }
 0x197   :  { %1338 = vsyncpa [#allocation7], 1 }

</bundles_post_ra>
